<compile_context>
chip_gen: v7x
topology: tpu7x:2x2x1
jax: 0.10.0
libtpu: 0.0.40
codegen_flags: <defaults>
</compile_context>

<pallas_src>
import jax
import jax.numpy as jnp
from jax.experimental import pallas as pl
from jax.experimental.pallas import tpu as pltpu

_BN_EPS = 1e-5
_LEAKY_SLOPE = 0.01
_PARAM_ORDER = ("tr_h1", "tr_h2", "tr_out", "glo_h1", "glo_out")


def _leaky(x):
    # LeakyReLU(0.01) as a single VPU max (valid since 0 < slope < 1).
    return jnp.maximum(x, _LEAKY_SLOPE * x)


def _glann_kernel(
    e_ref,                       # (TB, noise_dim) f32 uniform-noise tile
    w1t_ref, b1t_ref,            # translator hidden 1 (BN folded): W bf16, b f32
    w2t_ref, b2t_ref,            # translator hidden 2 (BN folded)
    w3t_ref, b3t_ref,            # translator output Linear (bias=True)
    w1g_ref, b1g_ref,            # glo hidden 1 (BN folded)
    w2g_ref, b2g_ref,            # glo output Linear (bias=True)
    out_ref,                     # (TB, out_dim) f32
):
    def dot(x, w_ref):
        # bf16 x bf16 -> f32 accumulate: native single-pass MXU on all gens.
        return jnp.dot(x.astype(w_ref.dtype), w_ref[...],
                       preferred_element_type=jnp.float32)

    x = e_ref[...]
    # translator.generator(e): [Linear(no bias)+BN+LeakyReLU]x2 -> Linear
    x = _leaky(dot(x, w1t_ref) + b1t_ref[...])
    x = _leaky(dot(x, w2t_ref) + b2t_ref[...])
    x = dot(x, w3t_ref) + b3t_ref[...]
    # glo.generator(code): [Linear(no bias)+BN+LeakyReLU] -> Linear
    x = _leaky(dot(x, w1g_ref) + b1g_ref[...])
    x = dot(x, w2g_ref) + b2g_ref[...]
    out_ref[...] = x.astype(out_ref.dtype)


def prepare_glann_params(raw, *, weight_dtype=jnp.bfloat16):
    """One-time parameter prep (do NOT call per forward):
      * transpose PyTorch (out,in) Linear weights to (in,out),
      * fold eval-mode BatchNorm1d into the preceding bias-free Linear,
      * cast weights to bf16 (MXU-native); keep biases f32 as (1, dim) rows.
    """
    def fold_bn(w_oi, bn):
        gamma, beta, mean, var = bn[0], bn[1], bn[2], bn[3]
        scale = gamma * jax.lax.rsqrt(var + _BN_EPS)          # (out,)
        w_io = w_oi.T * scale[None, :]                         # (in, out)
        bias = beta - mean * scale                             # (out,)
        return w_io, bias

    prepared = {}
    for name in ("tr_h1", "tr_h2", "glo_h1"):                  # Linear(no bias)+BN layers
        w, b = fold_bn(raw[name + "_w"], raw[name + "_bn"])
        prepared[name + "_w"] = w.astype(weight_dtype)
        prepared[name + "_b"] = b.reshape(1, -1).astype(jnp.float32)
    for name in ("tr_out", "glo_out"):                         # plain Linear(bias=True)
        prepared[name + "_w"] = raw[name + "_w"].T.astype(weight_dtype)
        prepared[name + "_b"] = raw[name + "_b"].reshape(1, -1).astype(jnp.float32)
    return prepared


def glann_forward(noise, prepared, *, block_batch=2048, vmem_budget_bytes=24 << 20):
    """out = glo.generator(translator.generator(noise)), fully fused in one kernel.

    noise:    (N, noise_dim) f32 uniform noise (stand-in for torch.rand).
    prepared: dict from prepare_glann_params() (weights (in,out) bf16, biases (1,out) f32).
    """
    n, noise_dim = noise.shape
    out_dim = prepared["glo_out_w"].shape[1]
    feat_dims = [noise_dim, out_dim] + [prepared[k + "_w"].shape[1] for k in _PARAM_ORDER]
    max_dim = max(feat_dims)

    # --- batch tile: biggest that fits the VMEM budget; keep >=2 tiles for
    #     moderate N so v7x's 2nd TensorCore has work (grid axis is "parallel").
    per_row_bytes = 4 * (2 * noise_dim + 2 * out_dim + 2 * max_dim)  # dbl-buffered IO + live acts
    tb_cap = max(8, min(block_batch, (vmem_budget_bytes // per_row_bytes) // 8 * 8))
    if n > tb_cap:
        tb = tb_cap
    elif n >= 1024:
        tb = ((n // 2 + 7) // 8) * 8          # split into >=2 tiles (multiple of 8)
    else:
        tb = n                                # whole batch in one block
    grid = (pl.cdiv(n, tb),)

    flat = (noise,) + tuple(prepared[k + s] for k in _PARAM_ORDER for s in ("_w", "_b"))

    in_specs = [pl.BlockSpec((tb, noise_dim), lambda i: (i, 0))] + [
        # constant index maps: weights/biases DMA'd once, resident in VMEM
        pl.BlockSpec(a.shape, lambda i: (0, 0)) for a in flat[1:]
    ]

    weight_bytes = sum(int(a.size) * a.dtype.itemsize for a in flat[1:])
    # Explicit scoped-VMEM limit: enough for weights + tiles + headroom, capped
    # at 48 MiB so it is valid on v7x (64 MiB physical) as well as v5e/v6e.
    vmem_limit = int(min(48 << 20,
                         max(32 << 20, 2 * weight_bytes + per_row_bytes * tb + (8 << 20))))

    return pl.pallas_call(
        _glann_kernel,
        out_shape=jax.ShapeDtypeStruct((n, out_dim), jnp.float32),
        grid_spec=pltpu.PrefetchScalarGridSpec(
            num_scalar_prefetch=0,
            grid=grid,
            in_specs=in_specs,
            out_specs=pl.BlockSpec((tb, out_dim), lambda i: (i, 0)),
        ),
        compiler_params=pltpu.CompilerParams(
            dimension_semantics=("parallel",),
            vmem_limit_bytes=vmem_limit,
        ),
    )(*flat)


# ----------------------------- parameters & references -----------------------------

def _linear_w(key, out_dim, in_dim):
    # PyTorch Linear weight layout (out_features, in_features), ~1/sqrt(fan_in) scale.
    return jax.random.normal(key, (out_dim, in_dim), jnp.float32) / jnp.sqrt(in_dim)


def _bn_params(key, dim):
    # Rows: gamma, beta, running_mean, running_var (randomized so BN is nontrivial).
    kg, kb, km, kv = jax.random.split(key, 4)
    gamma = 1.0 + 0.1 * jax.random.normal(kg, (dim,), jnp.float32)
    beta = 0.1 * jax.random.normal(kb, (dim,), jnp.float32)
    mean = 0.1 * jax.random.normal(km, (dim,), jnp.float32)
    var = jax.random.uniform(kv, (dim,), jnp.float32, minval=0.5, maxval=1.5)
    return jnp.stack([gamma, beta, mean, var], axis=0)  # (4, dim)


def init_glann_params(key, noise_dim, tr_hidden, latent_dim, glo_hidden, output_dim):
    # Kernel is specialized for translator hidden_dims=[H1,H2], glo hidden_dims=[H1].
    assert len(tr_hidden) == 2 and len(glo_hidden) == 1
    h1t, h2t = tr_hidden
    (h1g,) = glo_hidden
    ks = jax.random.split(key, 10)
    return {
        "tr_h1_w": _linear_w(ks[0], h1t, noise_dim),
        "tr_h1_bn": _bn_params(ks[1], h1t),
        "tr_h2_w": _linear_w(ks[2], h2t, h1t),
        "tr_h2_bn": _bn_params(ks[3], h2t),
        "tr_out_w": _linear_w(ks[4], latent_dim, h2t),
        "tr_out_b": 0.1 * jax.random.normal(ks[5], (latent_dim,), jnp.float32),
        "glo_h1_w": _linear_w(ks[6], h1g, latent_dim),
        "glo_h1_bn": _bn_params(ks[7], h1g),
        "glo_out_w": _linear_w(ks[8], output_dim, h1g),
        "glo_out_b": 0.1 * jax.random.normal(ks[9], (output_dim,), jnp.float32),
    }


def glann_reference(noise, prepared):
    """Pure-JAX mirror of the fused kernel math (same folded params, same bf16 dots)."""
    def dot(x, w):
        return jnp.dot(x.astype(w.dtype), w, preferred_element_type=jnp.float32)
    x = noise
    x = _leaky(dot(x, prepared["tr_h1_w"]) + prepared["tr_h1_b"])
    x = _leaky(dot(x, prepared["tr_h2_w"]) + prepared["tr_h2_b"])
    x = dot(x, prepared["tr_out_w"]) + prepared["tr_out_b"]
    x = _leaky(dot(x, prepared["glo_h1_w"]) + prepared["glo_h1_b"])
    x = dot(x, prepared["glo_out_w"]) + prepared["glo_out_b"]
    return x


def glann_reference_f32(noise, raw):
    """Eval-mode PyTorch-structured forward in full f32 (unfused BN) — sanity bound only."""
    def bn_leaky(x, bn):
        gamma, beta, mean, var = bn[0], bn[1], bn[2], bn[3]
        x = (x - mean) * jax.lax.rsqrt(var + _BN_EPS) * gamma + beta
        return _leaky(x)
    hi = jax.lax.Precision.HIGHEST
    x = noise
    x = bn_leaky(jnp.dot(x, raw["tr_h1_w"].T, precision=hi), raw["tr_h1_bn"])
    x = bn_leaky(jnp.dot(x, raw["tr_h2_w"].T, precision=hi), raw["tr_h2_bn"])
    x = jnp.dot(x, raw["tr_out_w"].T, precision=hi) + raw["tr_out_b"]
    x = bn_leaky(jnp.dot(x, raw["glo_h1_w"].T, precision=hi), raw["glo_h1_bn"])
    x = jnp.dot(x, raw["glo_out_w"].T, precision=hi) + raw["glo_out_b"]
    return x


if __name__ == "__main__":
    # Small deterministic config consistent with the module.
    batch = 8                 # N (== translator.batch_size)
    noise_dim = 16
    tr_hidden = (32, 32)      # translator generator hidden_dims
    latent_embed_dim = 32     # translator output_dim == glo generator input_dim
    glo_hidden = (64,)        # glo generator hidden_dims
    output_dim = 128          # lane-dense output (multiple of 128)

    key = jax.random.PRNGKey(0)
    k_noise, k_params = jax.random.split(key)
    raw_params = init_glann_params(k_params, noise_dim, tr_hidden, latent_embed_dim,
                                   glo_hidden, output_dim)
    # One-time prep: transpose + BN fold + bf16 cast (hoisted out of the forward path).
    prepared = prepare_glann_params(raw_params)

    # torch.rand(N, noise_dim) equivalent, generated deterministically host-side.
    # TODO(synk): could be moved in-kernel via pltpu.prng_seed/prng_random_bits to
    # drop the noise-input DMA, at the cost of checkability against this reference.
    noise = jax.random.uniform(k_noise, (batch, noise_dim), dtype=jnp.float32)

    out = glann_forward(noise, prepared)
    out = jax.block_until_ready(out)

    assert out.shape == (batch, output_dim)
    assert out.dtype == jnp.float32

    # Exact check against the pure-JAX mirror of the kernel math.
    ref = glann_reference(noise, prepared)
    max_diff = float(jnp.max(jnp.abs(out - ref)))
    assert jnp.allclose(out, ref, atol=1e-2, rtol=1e-2), f"max abs diff vs mirror ref {max_diff}"

    # Loose sanity bound against the full-f32 eval-mode forward (bf16 matmul path).
    f32_diff = float(jnp.max(jnp.abs(out - glann_reference_f32(noise, raw_params))))
    assert f32_diff < 0.5, f"bf16 fast path deviates too much from f32 reference: {f32_diff}"

    print("KERNEL_OK")
</pallas_src>

<mosaic_0001>
module attributes {stable_mosaic.version = 11 : i64} {
  func.func @_glann_kernel(%arg0: i32, %arg1: memref<8x16xf32, #tpu.memory_space<vmem>>, %arg2: memref<16x32xbf16, #tpu.memory_space<vmem>>, %arg3: memref<1x32xf32, #tpu.memory_space<vmem>>, %arg4: memref<32x32xbf16, #tpu.memory_space<vmem>>, %arg5: memref<1x32xf32, #tpu.memory_space<vmem>>, %arg6: memref<32x32xbf16, #tpu.memory_space<vmem>>, %arg7: memref<1x32xf32, #tpu.memory_space<vmem>>, %arg8: memref<32x64xbf16, #tpu.memory_space<vmem>>, %arg9: memref<1x64xf32, #tpu.memory_space<vmem>>, %arg10: memref<64x128xbf16, #tpu.memory_space<vmem>>, %arg11: memref<1x128xf32, #tpu.memory_space<vmem>>, %arg12: memref<8x128xf32, #tpu.memory_space<vmem>>) attributes {dimension_semantics = [#tpu.dimension_semantics<parallel>], iteration_bounds = array<i64: 1>, scalar_prefetch = 0 : i64, scratch_operands = 0 : i64, tpu.core_type = #tpu.core_type<tc>, window_params = [{transform_indices = @transform_0, window_bounds = array<i64: 8, 16>}, {pipeline_mode = #tpu.pipeline_mode<synchronous>, transform_indices = @transform_1, window_bounds = array<i64: 16, 32>}, {pipeline_mode = #tpu.pipeline_mode<synchronous>, transform_indices = @transform_2, window_bounds = array<i64: 1, 32>}, {pipeline_mode = #tpu.pipeline_mode<synchronous>, transform_indices = @transform_3, window_bounds = array<i64: 32, 32>}, {pipeline_mode = #tpu.pipeline_mode<synchronous>, transform_indices = @transform_4, window_bounds = array<i64: 1, 32>}, {pipeline_mode = #tpu.pipeline_mode<synchronous>, transform_indices = @transform_5, window_bounds = array<i64: 32, 32>}, {pipeline_mode = #tpu.pipeline_mode<synchronous>, transform_indices = @transform_6, window_bounds = array<i64: 1, 32>}, {pipeline_mode = #tpu.pipeline_mode<synchronous>, transform_indices = @transform_7, window_bounds = array<i64: 32, 64>}, {pipeline_mode = #tpu.pipeline_mode<synchronous>, transform_indices = @transform_8, window_bounds = array<i64: 1, 64>}, {pipeline_mode = #tpu.pipeline_mode<synchronous>, transform_indices = @transform_9, window_bounds = array<i64: 64, 128>}, {pipeline_mode = #tpu.pipeline_mode<synchronous>, transform_indices = @transform_10, window_bounds = array<i64: 1, 128>}, {transform_indices = @transform_11, window_bounds = array<i64: 8, 128>}]} {
    %c0 = arith.constant 0 : index
    %c0_0 = arith.constant 0 : index
    %0 = vector.load %arg1[%c0, %c0_0] : memref<8x16xf32, #tpu.memory_space<vmem>>, vector<8x16xf32>
    %1 = arith.truncf %0 : vector<8x16xf32> to vector<8x16xbf16>
    %c0_1 = arith.constant 0 : index
    %c0_2 = arith.constant 0 : index
    %2 = vector.load %arg2[%c0_1, %c0_2] : memref<16x32xbf16, #tpu.memory_space<vmem>>, vector<16x32xbf16>
    %cst = arith.constant dense<0.000000e+00> : vector<8x32xf32>
    %3 = tpu.matmul %1, %2, %cst {dimension_numbers = #tpu.dot_dimension_numbers<[1], [0], [0], [1], [0, 0, 1, 1], [], []>} : vector<8x16xbf16>, vector<16x32xbf16>, vector<8x32xf32> -> vector<8x32xf32>
    %c0_3 = arith.constant 0 : index
    %c0_4 = arith.constant 0 : index
    %4 = vector.load %arg3[%c0_3, %c0_4] : memref<1x32xf32, #tpu.memory_space<vmem>>, vector<1x32xf32>
    %5 = vector.broadcast %4 : vector<1x32xf32> to vector<8x32xf32>
    %6 = arith.addf %3, %5 : vector<8x32xf32>
    %cst_5 = arith.constant 0.00999999977 : f32
    %7 = vector.broadcast %cst_5 : f32 to vector<8x32xf32>
    %8 = arith.mulf %7, %6 : vector<8x32xf32>
    %9 = arith.maximumf %6, %8 : vector<8x32xf32>
    %10 = arith.truncf %9 : vector<8x32xf32> to vector<8x32xbf16>
    %c0_6 = arith.constant 0 : index
    %c0_7 = arith.constant 0 : index
    %11 = vector.load %arg4[%c0_6, %c0_7] : memref<32x32xbf16, #tpu.memory_space<vmem>>, vector<32x32xbf16>
    %cst_8 = arith.constant dense<0.000000e+00> : vector<8x32xf32>
    %12 = tpu.matmul %10, %11, %cst_8 {dimension_numbers = #tpu.dot_dimension_numbers<[1], [0], [0], [1], [0, 0, 1, 1], [], []>} : vector<8x32xbf16>, vector<32x32xbf16>, vector<8x32xf32> -> vector<8x32xf32>
    %c0_9 = arith.constant 0 : index
    %c0_10 = arith.constant 0 : index
    %13 = vector.load %arg5[%c0_9, %c0_10] : memref<1x32xf32, #tpu.memory_space<vmem>>, vector<1x32xf32>
    %14 = vector.broadcast %13 : vector<1x32xf32> to vector<8x32xf32>
    %15 = arith.addf %12, %14 : vector<8x32xf32>
    %cst_11 = arith.constant 0.00999999977 : f32
    %16 = vector.broadcast %cst_11 : f32 to vector<8x32xf32>
    %17 = arith.mulf %16, %15 : vector<8x32xf32>
    %18 = arith.maximumf %15, %17 : vector<8x32xf32>
    %19 = arith.truncf %18 : vector<8x32xf32> to vector<8x32xbf16>
    %c0_12 = arith.constant 0 : index
    %c0_13 = arith.constant 0 : index
    %20 = vector.load %arg6[%c0_12, %c0_13] : memref<32x32xbf16, #tpu.memory_space<vmem>>, vector<32x32xbf16>
    %cst_14 = arith.constant dense<0.000000e+00> : vector<8x32xf32>
    %21 = tpu.matmul %19, %20, %cst_14 {dimension_numbers = #tpu.dot_dimension_numbers<[1], [0], [0], [1], [0, 0, 1, 1], [], []>} : vector<8x32xbf16>, vector<32x32xbf16>, vector<8x32xf32> -> vector<8x32xf32>
    %c0_15 = arith.constant 0 : index
    %c0_16 = arith.constant 0 : index
    %22 = vector.load %arg7[%c0_15, %c0_16] : memref<1x32xf32, #tpu.memory_space<vmem>>, vector<1x32xf32>
    %23 = vector.broadcast %22 : vector<1x32xf32> to vector<8x32xf32>
    %24 = arith.addf %21, %23 : vector<8x32xf32>
    %25 = arith.truncf %24 : vector<8x32xf32> to vector<8x32xbf16>
    %c0_17 = arith.constant 0 : index
    %c0_18 = arith.constant 0 : index
    %26 = vector.load %arg8[%c0_17, %c0_18] : memref<32x64xbf16, #tpu.memory_space<vmem>>, vector<32x64xbf16>
    %cst_19 = arith.constant dense<0.000000e+00> : vector<8x64xf32>
    %27 = tpu.matmul %25, %26, %cst_19 {dimension_numbers = #tpu.dot_dimension_numbers<[1], [0], [0], [1], [0, 0, 1, 1], [], []>} : vector<8x32xbf16>, vector<32x64xbf16>, vector<8x64xf32> -> vector<8x64xf32>
    %c0_20 = arith.constant 0 : index
    %c0_21 = arith.constant 0 : index
    %28 = vector.load %arg9[%c0_20, %c0_21] : memref<1x64xf32, #tpu.memory_space<vmem>>, vector<1x64xf32>
    %29 = vector.broadcast %28 : vector<1x64xf32> to vector<8x64xf32>
    %30 = arith.addf %27, %29 : vector<8x64xf32>
    %cst_22 = arith.constant 0.00999999977 : f32
    %31 = vector.broadcast %cst_22 : f32 to vector<8x64xf32>
    %32 = arith.mulf %31, %30 : vector<8x64xf32>
    %33 = arith.maximumf %30, %32 : vector<8x64xf32>
    %34 = arith.truncf %33 : vector<8x64xf32> to vector<8x64xbf16>
    %c0_23 = arith.constant 0 : index
    %c0_24 = arith.constant 0 : index
    %35 = vector.load %arg10[%c0_23, %c0_24] : memref<64x128xbf16, #tpu.memory_space<vmem>>, vector<64x128xbf16>
    %cst_25 = arith.constant dense<0.000000e+00> : vector<8x128xf32>
    %36 = tpu.matmul %34, %35, %cst_25 {dimension_numbers = #tpu.dot_dimension_numbers<[1], [0], [0], [1], [0, 0, 1, 1], [], []>} : vector<8x64xbf16>, vector<64x128xbf16>, vector<8x128xf32> -> vector<8x128xf32>
    %c0_26 = arith.constant 0 : index
    %c0_27 = arith.constant 0 : index
    %37 = vector.load %arg11[%c0_26, %c0_27] : memref<1x128xf32, #tpu.memory_space<vmem>>, vector<1x128xf32>
    %38 = vector.broadcast %37 : vector<1x128xf32> to vector<8x128xf32>
    %39 = arith.addf %36, %38 : vector<8x128xf32>
    %c0_28 = arith.constant 0 : index
    %c0_29 = arith.constant 0 : index
    %40 = vector.load %arg12[%c0_28, %c0_29] : memref<8x128xf32, #tpu.memory_space<vmem>>, vector<8x128xf32>
    tpu.vector_store %arg12[%c0_28, %c0_29], %39 {strides = array<i32>} : memref<8x128xf32, #tpu.memory_space<vmem>>, vector<8x128xf32>,
    return
  }
  func.func @transform_0(%arg0: i32) -> (i32, i32) {
    %c0_i32 = arith.constant 0 : i32
    %c0_i32_0 = arith.constant 0 : i32
    return %arg0, %c0_i32 : i32, i32
  }
  func.func @transform_1(%arg0: i32) -> (i32, i32) {
    %c0_i32 = arith.constant 0 : i32
    %c0_i32_0 = arith.constant 0 : i32
    %c0_i32_1 = arith.constant 0 : i32
    return %c0_i32, %c0_i32_0 : i32, i32
  }
  func.func @transform_2(%arg0: i32) -> (i32, i32) {
    %c0_i32 = arith.constant 0 : i32
    %c0_i32_0 = arith.constant 0 : i32
    %c0_i32_1 = arith.constant 0 : i32
    return %c0_i32, %c0_i32_0 : i32, i32
  }
  func.func @transform_3(%arg0: i32) -> (i32, i32) {
    %c0_i32 = arith.constant 0 : i32
    %c0_i32_0 = arith.constant 0 : i32
    %c0_i32_1 = arith.constant 0 : i32
    return %c0_i32, %c0_i32_0 : i32, i32
  }
  func.func @transform_4(%arg0: i32) -> (i32, i32) {
    %c0_i32 = arith.constant 0 : i32
    %c0_i32_0 = arith.constant 0 : i32
    %c0_i32_1 = arith.constant 0 : i32
    return %c0_i32, %c0_i32_0 : i32, i32
  }
  func.func @transform_5(%arg0: i32) -> (i32, i32) {
    %c0_i32 = arith.constant 0 : i32
    %c0_i32_0 = arith.constant 0 : i32
    %c0_i32_1 = arith.constant 0 : i32
    return %c0_i32, %c0_i32_0 : i32, i32
  }
  func.func @transform_6(%arg0: i32) -> (i32, i32) {
    %c0_i32 = arith.constant 0 : i32
    %c0_i32_0 = arith.constant 0 : i32
    %c0_i32_1 = arith.constant 0 : i32
    return %c0_i32, %c0_i32_0 : i32, i32
  }
  func.func @transform_7(%arg0: i32) -> (i32, i32) {
    %c0_i32 = arith.constant 0 : i32
    %c0_i32_0 = arith.constant 0 : i32
    %c0_i32_1 = arith.constant 0 : i32
    return %c0_i32, %c0_i32_0 : i32, i32
  }
  func.func @transform_8(%arg0: i32) -> (i32, i32) {
    %c0_i32 = arith.constant 0 : i32
    %c0_i32_0 = arith.constant 0 : i32
    %c0_i32_1 = arith.constant 0 : i32
    return %c0_i32, %c0_i32_0 : i32, i32
  }
  func.func @transform_9(%arg0: i32) -> (i32, i32) {
    %c0_i32 = arith.constant 0 : i32
    %c0_i32_0 = arith.constant 0 : i32
    %c0_i32_1 = arith.constant 0 : i32
    return %c0_i32, %c0_i32_0 : i32, i32
  }
  func.func @transform_10(%arg0: i32) -> (i32, i32) {
    %c0_i32 = arith.constant 0 : i32
    %c0_i32_0 = arith.constant 0 : i32
    %c0_i32_1 = arith.constant 0 : i32
    return %c0_i32, %c0_i32_0 : i32, i32
  }
  func.func @transform_11(%arg0: i32) -> (i32, i32) {
    %c0_i32 = arith.constant 0 : i32
    %c0_i32_0 = arith.constant 0 : i32
    return %arg0, %c0_i32 : i32, i32
  }
}

</mosaic_0001>

<bundles_post_ra>
// kernel: tpu_custom_call.1
= control target key start
LH: loop header
LB: loop body
LE: loop exit
PB: predicated region body
PF: predicated region fallthrough
CT: control target
= control target key end

     0   :  { %16 = vsyncpa [#allocation3], 0  ;;  %s1014_s0 = inlined_call_operand.hbm [shape: f32[8,16], index: 0, kind: input, shape index: {}]   ;;  %s1015_s1 = inlined_call_operand.hbm [shape: bf16[16,32], index: 1, kind: input, shape index: {}]   ;;  %s1016_s2 = inlined_call_operand.vmem [shape: f32[1,32], index: 2, kind: input, shape index: {}]   ;;  %s1017_s3 = inlined_call_operand.hbm [shape: bf16[32,32], index: 3, kind: input, shape index: {}]   ;;  %s1018_s4 = inlined_call_operand.vmem [shape: f32[1,32], index: 4, kind: input, shape index: {}]   ;;  %s1019_s5 = inlined_call_operand.hbm [shape: bf16[32,32], index: 5, kind: input, shape index: {}]   ;;  %s1020_s6 = inlined_call_operand.hbm [shape: f32[1,32], index: 6, kind: input, shape index: {}]   ;;  %s1021_s7 = inlined_call_operand.hbm [shape: bf16[32,64], index: 7, kind: input, shape index: {}]   ;;  %s1022_s8 = inlined_call_operand.hbm [shape: f32[1,64], index: 8, kind: input, shape index: {}]   ;;  %s1023_s9 = inlined_call_operand.vmem [shape: bf16[64,128], index: 9, kind: input, shape index: {}]   ;;  %s1024_s10 = inlined_call_operand.vmem [shape: f32[1,128], index: 10, kind: input, shape index: {}]   ;;  %s1025_s11 = inlined_call_operand.hbm [shape: f32[8,128], index: 11, kind: output, shape index: {}]  }
   0x1   :  { %17 = vsyncpa [#allocation6], 0 }
   0x2   :  { %18 = vsyncpa [#allocation9], 0 }
   0x3   :  { %19 = vsyncpa [#allocation12], 0 }
   0x4   :  { %20 = vsyncpa [#allocation4], 0  ;;  %s789_s17 = smov [#allocation5]   ;;  %s603_s21 = scalar_lea.hbm %s1015_s1, 128 }
   0x5   :  { %s36_s18 = sshll.u32 %s789_s17, 4  ;;  %p604_p0 = scmp.ne.s32.totalorder %s1015_s1, %s603_s21  ;;  %s37_s18 = int_to_ptr.vmem [resolvable:$true] %s36_s18 }
   0x6   :  { %p607_p1 = scmp.lt.u32.totalorder %s603_s21, %s1015_s1 }
   0x8   :  { %p609_p2 = pnand %p607_p1, %p604_p0 }
   0xa   :  { %612 = shalt.err (!%p609_p2)
}
   0xb   :  { %s613_s26 = scalar_lea.vmem %s37_s18, 128  ;;  %p618_p4 = scmp.lt.s32.totalorder %s37_s18, %s37_s18 }
   0xc   :  { %p614_p3 = scmp.ne.s32.totalorder %s37_s18, %s613_s26  ;;  %p619_p5 = scmp.lt.s32.totalorder %s613_s26, %s613_s26 }
   0xe   :  { %p620_p6 = por %p619_p5, %p618_p4 }
  0x10   :  { %p621_p7 = pnand %p620_p6, %p614_p3 }
  0x12   :  { %624 = shalt.err (!%p621_p7)
}
  0x13   :  { %s790_s27 = smov 64   ;;  %s791_s28 = smov 4  }
  0x14   :  { %42 = dma.hbm_to_vmem [thread:$0]  %s1015_s1, 128, %s37_s18, [#allocation6], %s790_s27, %s790_s27, %s791_s28  }
  0x15   :  { %s792_s12 = smov [#allocation8]   ;;  %s793_s14 = smov [#allocation11]  }
  0x16   :  { %s64_s13 = sshll.u32 %s792_s12, 4  ;;  %s86_s15 = sshll.u32 %s793_s14, 4  ;;  %s65_s13 = int_to_ptr.vmem [resolvable:$true] %s64_s13  ;;  %s87_s15 = int_to_ptr.vmem [resolvable:$true] %s86_s15 }
  0x17   :  { %s625_s19 = scalar_lea.hbm %s1019_s5, 256 }
  0x18   :  { %p626_p8 = scmp.ne.s32.totalorder %s1019_s5, %s625_s19  ;;  %p629_p9 = scmp.lt.u32.totalorder %s625_s19, %s1019_s5 }
  0x1a   :  { %p631_p10 = pnand %p629_p9, %p626_p8 }
  0x1c   :  { %634 = shalt.err (!%p631_p10)
}
  0x1d   :  { %s635_s1 = scalar_lea.vmem %s65_s13, 256  ;;  %p640_p12 = scmp.lt.s32.totalorder %s65_s13, %s65_s13 }
  0x1e   :  { %p636_p11 = scmp.ne.s32.totalorder %s65_s13, %s635_s1  ;;  %p641_p13 = scmp.lt.s32.totalorder %s635_s1, %s635_s1 }
  0x20   :  { %p642_p0 = por %p641_p13, %p640_p12 }
  0x22   :  { %p643_p1 = pnand %p642_p0, %p636_p11 }
  0x24   :  { %646 = shalt.err (!%p643_p1)
}
  0x25   :  { %70 = dma.hbm_to_vmem [thread:$0]  %s1019_s5, 256, %s65_s13, [#allocation9], %s790_s27, %s790_s27, %s791_s28  }
  0x26   :  { %s647_s29 = scalar_lea.hbm %s1021_s7, 256 }
  0x27   :  { %p648_p2 = scmp.ne.s32.totalorder %s1021_s7, %s647_s29  ;;  %p651_p3 = scmp.lt.u32.totalorder %s647_s29, %s1021_s7 }
  0x29   :  { %p653_p4 = pnand %p651_p3, %p648_p2 }
  0x2b   :  { %656 = shalt.err (!%p653_p4)
}
  0x2c   :  { %s657_s17 = scalar_lea.vmem %s87_s15, 256  ;;  %p662_p6 = scmp.lt.s32.totalorder %s87_s15, %s87_s15 }
  0x2d   :  { %p658_p5 = scmp.ne.s32.totalorder %s87_s15, %s657_s17  ;;  %p663_p7 = scmp.lt.s32.totalorder %s657_s17, %s657_s17 }
  0x2f   :  { %p664_p8 = por %p663_p7, %p662_p6 }
  0x31   :  { %p665_p9 = pnand %p664_p8, %p658_p5 }
  0x33   :  { %668 = shalt.err (!%p665_p9)
}
  0x34   :  { %92 = dma.hbm_to_vmem [thread:$0]  %s1021_s7, 256, %s87_s15, [#allocation12], %s790_s27, %s790_s27, %s791_s28  }
  0x35   :  { %s794_s19 = smov [#allocation2]   ;;  %s795_s21 = smov [#allocation7]  }
  0x36   :  { %s27_s20 = sshll.u32 %s794_s19, 4  ;;  %s50_s22 = sshll.u32 %s795_s21, 4  ;;  %s28_s20 = int_to_ptr.vmem [resolvable:$true] %s27_s20  ;;  %s51_s22 = int_to_ptr.vmem [resolvable:$true] %s50_s22 }
  0x37   :  { %s669_s18 = scalar_lea.hbm %s1014_s0, 128 }
  0x38   :  { %p670_p10 = scmp.ne.s32.totalorder %s1014_s0, %s669_s18  ;;  %p673_p11 = scmp.lt.u32.totalorder %s669_s18, %s1014_s0 }
  0x3a   :  { %p675_p12 = pnand %p673_p11, %p670_p10 }
  0x3c   :  { %678 = shalt.err (!%p675_p12)
}
  0x3d   :  { %s679_s7 = scalar_lea.vmem %s28_s20, 128  ;;  %p684_p0 = scmp.lt.s32.totalorder %s28_s20, %s28_s20 }
  0x3e   :  { %p680_p13 = scmp.ne.s32.totalorder %s28_s20, %s679_s7  ;;  %p685_p1 = scmp.lt.s32.totalorder %s679_s7, %s679_s7 }
  0x40   :  { %p686_p2 = por %p685_p1, %p684_p0 }
  0x42   :  { %p687_p3 = pnand %p686_p2, %p680_p13 }
  0x44   :  { %690 = shalt.err (!%p687_p3)
}
  0x45   :  { %30 = dma.hbm_to_vmem [thread:$0]  %s1014_s0, 128, %s28_s20, [#allocation3]  }
  0x46   :  { %s691_s16 = scalar_lea.hbm %s1017_s3, 256 }
  0x47   :  { %p692_p4 = scmp.ne.s32.totalorder %s1017_s3, %s691_s16  ;;  %p695_p5 = scmp.lt.u32.totalorder %s691_s16, %s1017_s3 }
  0x49   :  { %p697_p6 = pnand %p695_p5, %p692_p4 }
  0x4b   :  { %700 = shalt.err (!%p697_p6)
}
  0x4c   :  { %s701_s21 = scalar_lea.vmem %s51_s22, 256  ;;  %p706_p8 = scmp.lt.s32.totalorder %s51_s22, %s51_s22 }
  0x4d   :  { %p702_p7 = scmp.ne.s32.totalorder %s51_s22, %s701_s21  ;;  %p707_p9 = scmp.lt.s32.totalorder %s701_s21, %s701_s21 }
  0x4f   :  { %p708_p10 = por %p707_p9, %p706_p8 }
  0x51   :  { %p709_p11 = pnand %p708_p10, %p702_p7 }
  0x53   :  { %712 = shalt.err (!%p709_p11)
}
  0x54   :  { %56 = dma.hbm_to_vmem [thread:$0]  %s1017_s3, 256, %s51_s22, [#allocation6], %s790_s27, %s790_s27, %s791_s28  }
  0x55   :  { %s796_s23 = smov [#allocation10]   ;;  %s797_s18 = smov [#allocation13]  }
  0x56   :  { %s77_s1 = sshll.u32 %s796_s23, 4  ;;  %s99_s24 = sshll.u32 %s797_s18, 4  ;;  %s78_s1 = int_to_ptr.vmem [resolvable:$true] %s77_s1  ;;  %s100_s24 = int_to_ptr.vmem [resolvable:$true] %s99_s24 }
  0x57   :  { %s713_s29 = scalar_lea.hbm %s1020_s6, 16 }
  0x58   :  { %p714_p12 = scmp.ne.s32.totalorder %s1020_s6, %s713_s29  ;;  %p717_p13 = scmp.lt.u32.totalorder %s713_s29, %s1020_s6 }
  0x5a   :  { %p719_p0 = pnand %p717_p13, %p714_p12 }
  0x5c   :  { %722 = shalt.err (!%p719_p0)
}
  0x5d   :  { %s723_s3 = scalar_lea.vmem %s78_s1, 16  ;;  %s727_s27 = scalar_lea.vmem %s78_s1, 32 }
  0x5e   :  { %p724_p1 = scmp.ne.s32.totalorder %s78_s1, %s723_s3  ;;  %p728_p2 = scmp.lt.s32.totalorder %s78_s1, %s78_s1 }
  0x5f   :  { %p729_p3 = scmp.lt.s32.totalorder %s727_s27, %s723_s3 }
  0x61   :  { %p730_p4 = por %p729_p3, %p728_p2 }
  0x63   :  { %p731_p5 = pnand %p730_p4, %p724_p1 }
  0x65   :  { %734 = shalt.err (!%p731_p5)
}
  0x66   :  { %80 = dma.hbm_to_vmem [thread:$0]  %s1020_s6, 16, %s78_s1, [#allocation9]  }
  0x67   :  { %s735_s17 = scalar_lea.hbm %s1022_s8, 16 }
  0x68   :  { %p736_p6 = scmp.ne.s32.totalorder %s1022_s8, %s735_s17  ;;  %p739_p7 = scmp.lt.u32.totalorder %s735_s17, %s1022_s8 }
  0x6a   :  { %p741_p8 = pnand %p739_p7, %p736_p6 }
  0x6c   :  { %744 = shalt.err (!%p741_p8)
}
  0x6d   :  { %s745_s0 = scalar_lea.vmem %s100_s24, 16  ;;  %s749_s20 = scalar_lea.vmem %s100_s24, 32 }
  0x6e   :  { %p746_p9 = scmp.ne.s32.totalorder %s100_s24, %s745_s0  ;;  %p750_p10 = scmp.lt.s32.totalorder %s100_s24, %s100_s24 }
  0x6f   :  { %p751_p11 = scmp.lt.s32.totalorder %s749_s20, %s745_s0 }
  0x71   :  { %p752_p12 = por %p751_p11, %p750_p10 }
  0x73   :  { %p753_p13 = pnand %p752_p12, %p746_p9 }
  0x75   :  { %756 = shalt.err (!%p753_p13)
}
  0x76   :  { %102 = dma.hbm_to_vmem [thread:$0]  %s1022_s8, 16, %s100_s24, [#allocation12]  }
  0x77   :  { %779 = dma.done.wait [#allocation3], 128  }
  0x78   :  { %780 = vsyncadd [#allocation3], 4294967168 }
  0x79   :  { %781 = dma.done.wait [#allocation6], 384  }
  0x7a   :  { %782 = vsyncadd [#allocation6], 4294966912 }
  0x7b   :  { %783 = dma.done.wait [#allocation9], 272  }
  0x7c   :  { %784 = vsyncadd [#allocation9], 4294967024 }
  0x7d   :  { %785 = dma.done.wait [#allocation12], 272  }
  0x7e   :  { %786 = vsyncadd [#allocation12], 4294967024  ;;  %v798_v0 = vmov 0.0   ;;  %vm799_vm0 = vmmov 0   ;;  %v592_v1 = vld [vmem:[#allocation5] sm:$0xff]   ;;  %v129_v2 = vld [vmem:[#allocation2] sm:$0xff] }
  0x7f   :  { %538 = vmatprep.subr.bf16.mxu1 %v798_v0  ;;  %540 = vmatprep.mubr.msk.bf16.mxu1 %vm799_vm0, %v798_v0  ;;  %vm146_vm1 = vcmask 130048   ;;  %v130_v3 = vpack.c.bf16 %v129_v2, %v129_v2  ;;  %v593_v4 = vld [vmem:[#allocation7] sm:$0xff]   ;;  %v594_v5 = vld [vmem:[#allocation7 + $0x8] sm:$0xff]   ;;  %v501_v6 = vld [vmem:[%s1016_s2] ss:$0 sm:$0xff]  ;;  %vm216_vm2 = vcmask 261120  }
  0x80   :  { %552 = vmatprep.subr.bf16.mxu0 %v798_v0  ;;  %556 = vmatprep.mubr.msk.bf16.mxu0 %vm799_vm0, %v798_v0  ;;  %v595_v15 = vld [vmem:[#allocation8] sm:$0xff]   ;;  %v596_v16 = vld [vmem:[#allocation8 + $0x8] sm:$0xff]   ;;  %v597_v17 = vld [vmem:[#allocation11] sm:$0xff]   ;;  %vm438_vm3 = vcmask 523264   ;;  %s800_s27 = smov [#allocation14]  }
  0x81   :  { %539 = vmatpush3.bf16.msra.mxu1 %v592_v1  ;;  %553 = vmatpush3.bf16.msra.mxu0 %v595_v15  ;;  %v504_v18 = vld [vmem:[%s1018_s4] ss:$0 sm:$0xff]  ;;  %v600_v29 = vld [vmem:[%s1023_s9 + $0x8] sm:$0xff]   ;;  %v508_v30 = vld [vmem:[#allocation10] ss:$0 sm:$0xff]  ;;  %s489_s28 = sshll.u32 %s800_s27, 4  ;;  %s490_s28 = int_to_ptr.vmem [resolvable:$true] %s489_s28 }
  0x82   :  { %544 = vmatprep.subr.bf16.mxu1 %v798_v0  ;;  %554 = vmatprep.subr.bf16.mxu0 %v798_v0  ;;  %v598_v27 = vld [vmem:[#allocation11 + $0x8] sm:$0xff]   ;;  %v601_v37 = vld [vmem:[%s1023_s9 + $0x10] sm:$0xff]   ;;  %v512_v39 = vld [vmem:[#allocation13] ss:$0 sm:$0xff]  ;;  %p762_p1 = scmp.lt.s32.totalorder %s490_s28, %s490_s28 }
  0x83   :  { %v599_v28 = vld [vmem:[%s1023_s9] sm:$0xff]   ;;  %v602_v38 = vld [vmem:[%s1023_s9 + $0x18] sm:$0xff]   ;;  %s757_s9 = scalar_lea.vmem %s490_s28, 128 }
  0x84   :  { %541 = vmatmul.mubr.msk.bf16.vlgmr.msra.gmra.mrb[0].mxu1 %vm146_vm1, %v130_v3  ;;  %v516_v48 = vld [vmem:[%s1024_s10] ss:$0 sm:$0xff]  ;;  %p758_p0 = scmp.ne.s32.totalorder %s490_s28, %s757_s9  ;;  %p763_p2 = scmp.lt.s32.totalorder %s757_s9, %s757_s9 }
  0x85   :  { %548 = vmatprep.mubr.msk.bf16.mxu1 %vm799_vm0, %v798_v0  ;;  %545 = vmatpush3.bf16.msra.mxu1 %v593_v4 }
  0x86   :  { %546 = vmatprep.subr.bf16.mxu1 %v798_v0  ;;  %555 = vmatpush3.bf16.msra.mxu0 %v596_v16  ;;  %p764_p3 = por %p763_p2, %p762_p1 }
  0x87   :  { %568 = vmatprep.subr.bf16.mxu0 %v798_v0 }
  0x88   :  { %p765_p4 = pnand %p764_p3, %p758_p0 }
  0x89   :  { %547 = vmatpush3.bf16.msra.mxu1 %v594_v5 }
  0x8a   :  { %560 = vmatprep.subr.bf16.mxu1 %v798_v0 }
 0x157   :  { %v184_v7 = vpop.f32.mrb[0].mxu1 }
 0x158   :  { %v185_v8 = vadd.f32 %v501_v6, %v184_v7  ;;  %v542_v9 = vpop.f32.mrb[1].mxu1 }
 0x159   :  { %v187_v10 = vpop.f32.mrb[2].mxu1 }
 0x15a   :  { %v190_v11 = vmul.f32 0.01, %v185_v8  ;;  %v543_v12 = vpop.f32.mrb[3].mxu1 }
 0x15c   :  { %v191_v13 = vmax.f32 %v185_v8, %v190_v11 }
 0x15e   :  { %v192_v14 = vpack.c.bf16 %v191_v13, %v191_v13 }
 0x160   :  { %549 = vmatmul.mubr.msk.bf16.vlgmr.msra.gmra.mrb[4].mxu1 %vm216_vm2, %v192_v14 }
 0x161   :  { %564 = vmatprep.mubr.msk.bf16.mxu1 %vm799_vm0, %v798_v0  ;;  %561 = vmatpush3.bf16.msra.mxu1 %v597_v17 }
 0x162   :  { %562 = vmatprep.subr.bf16.mxu1 %v798_v0 }
 0x165   :  { %563 = vmatpush3.bf16.msra.mxu1 %v598_v27 }
 0x233   :  { %v254_v19 = vpop.f32.mrb[4].mxu1 }
 0x234   :  { %v255_v20 = vadd.f32 %v504_v18, %v254_v19  ;;  %v550_v21 = vpop.f32.mrb[5].mxu1 }
 0x235   :  { %v257_v22 = vpop.f32.mrb[6].mxu1 }
 0x236   :  { %v260_v23 = vmul.f32 0.01, %v255_v20  ;;  %v551_v24 = vpop.f32.mrb[7].mxu1 }
 0x238   :  { %v261_v25 = vmax.f32 %v255_v20, %v260_v23 }
 0x23a   :  { %v262_v26 = vpack.c.bf16 %v261_v25, %v261_v25 }
 0x23c   :  { %557 = vmatmul.mubr.msk.bf16.vlgmr.msra.gmra.mrb[0].mxu0 %vm216_vm2, %v262_v26 }
 0x23d   :  { %576 = vmatprep.mubr.msk.bf16.mxu0 %vm799_vm0, %v798_v0  ;;  %569 = vmatpush3.bf16.msra.mxu0 %v599_v28 }
 0x23e   :  { %570 = vmatprep.subr.bf16.mxu0 %v798_v0 }
 0x241   :  { %571 = vmatpush3.bf16.msra.mxu0 %v600_v29 }
 0x242   :  { %572 = vmatprep.subr.bf16.mxu0 %v798_v0 }
 0x245   :  { %573 = vmatpush3.bf16.msra.mxu0 %v601_v37 }
 0x246   :  { %574 = vmatprep.subr.bf16.mxu0 %v798_v0 }
 0x249   :  { %575 = vmatpush3.bf16.msra.mxu0 %v602_v38 }
 0x30f   :  { %v323_v31 = vpop.f32.mrb[0].mxu0 }
 0x310   :  { %v324_v32 = vadd.f32 %v508_v30, %v323_v31  ;;  %v558_v33 = vpop.f32.mrb[1].mxu0 }
 0x311   :  { %v326_v34 = vpop.f32.mrb[2].mxu0 }
 0x312   :  { %v329_v35 = vpack.c.bf16 %v324_v32, %v324_v32  ;;  %v559_v36 = vpop.f32.mrb[3].mxu0 }
 0x314   :  { %565 = vmatmul.mubr.msk.bf16.vlgmr.msra.gmra.mrb[8].mxu1 %vm216_vm2, %v329_v35 }
 0x3e7   :  { %v390_v40 = vpop.f32.mrb[8].mxu1 }
 0x3e8   :  { %v391_v41 = vadd.f32 %v512_v39, %v390_v40  ;;  %v566_v42 = vpop.f32.mrb[9].mxu1 }
 0x3e9   :  { %v393_v43 = vpop.f32.mrb[10].mxu1 }
 0x3ea   :  { %v396_v44 = vmul.f32 0.01, %v391_v41  ;;  %v567_v45 = vpop.f32.mrb[11].mxu1 }
 0x3ec   :  { %v397_v46 = vmax.f32 %v391_v41, %v396_v44 }
 0x3ee   :  { %v398_v47 = vpack.c.bf16 %v397_v46, %v397_v46 }
 0x3f0   :  { %577 = vmatmul.mubr.msk.bf16.vlgmr.msra.gmra.mrb[4].mxu0 %vm438_vm3, %v398_v47 }
 0x4c3   :  { %v476_v49 = vpop.f32.mrb[4].mxu0 }
 0x4c4   :  { %v477_v50 = vadd.f32 %v516_v48, %v476_v49  ;;  %v578_v51 = vpop.f32.mrb[5].mxu0 }
 0x4c5   :  { %v479_v52 = vpop.f32.mrb[6].mxu0 }
 0x4c6   :  { %482 = vst [vmem:[#allocation14] sm:$0xff] %v477_v50  ;;  %v579_v53 = vpop.f32.mrb[7].mxu0 }
 0x4c7   :  { %768 = shalt.err (!%p765_p4)
}
 0x4c8   :  { %s769_s10 = scalar_lea.hbm %s1025_s11, 128 }
 0x4c9   :  { %p770_p5 = scmp.ne.s32.totalorder %s1025_s11, %s769_s10  ;;  %p773_p6 = scmp.lt.u32.totalorder %s769_s10, %s1025_s11 }
 0x4cb   :  { %p775_p7 = pnand %p773_p6, %p770_p5 }
 0x4cd   :  { %778 = shalt.err (!%p775_p7)
}
 0x4ce   :  { %492 = dma.vmem_to_hbm [thread:$0]  %s490_s28, 128, %s1025_s11, [#allocation4]  }
 0x4cf   :  { %787 = dma.done.wait [#allocation4], 128  }
 0x4d0   :  { %788 = vsyncadd [#allocation4], 4294967168 }
 0x4d1   :  { %496 = vsyncpa [#allocation3], 1 }
 0x4d2   :  { %497 = vsyncpa [#allocation6], 1 }
 0x4d3   :  { %498 = vsyncpa [#allocation9], 1 }
 0x4d4   :  { %499 = vsyncpa [#allocation12], 1 }
 0x4d5   :  { %500 = vsyncpa [#allocation4], 1 }

</bundles_post_ra>
